<compile_context>
chip_gen: v5e
topology: v5e:2x2
jax: 0.10.0
libtpu: 0.0.40
codegen_flags: <defaults>
</compile_context>

<pallas_src>
import jax
import jax.numpy as jnp
from jax.experimental import pallas as pl
from jax.experimental.pallas import tpu as pltpu


def _round_up(x, m):
    return (x + m - 1) // m * m


def diag_gaussian_mean_kernel(x_ref, w_ref, b_ref, mean_ref):
    # mean tile = x_tile @ W + b   (MXU matmul, f32 accumulation)
    mean = jnp.dot(x_ref[...], w_ref[...], preferred_element_type=jnp.float32)
    mean = mean + b_ref[...].astype(jnp.float32)
    mean_ref[...] = mean.astype(mean_ref.dtype)


def diag_gaussian_forward(x, weight_t, bias, logstd, *, block_b=2048,
                          compute_dtype=jnp.bfloat16):
    """x: (B, num_inputs); weight_t: (num_inputs, num_outputs);
    bias, logstd: (1, num_outputs).

    Returns (mean, std): mean is (B, num_outputs) in x.dtype, std is a
    (1, num_outputs) row (broadcastable against mean, exactly the same
    Normal(mean, std) the PyTorch module parameterizes)."""
    B, K = x.shape
    N = weight_t.shape[1]
    out_dtype = x.dtype

    # Cast matmul inputs to bf16 (or requested compute dtype): halves the
    # dominant HBM read traffic on this bandwidth-bound op. Accumulation and
    # bias add stay f32 inside the kernel.
    x_c = x.astype(compute_dtype)
    w_c = weight_t.astype(compute_dtype)
    b_c = bias.astype(jnp.float32)

    # Batch tile:
    #  * tiny batch  -> single full block (block dim == array dim, always legal)
    #  * medium      -> split into >= 2 blocks so v7x's second TC gets work
    #  * large       -> block_b-row tiles (multiple of 16 for bf16 packing)
    assert block_b % 16 == 0
    if B <= 16:
        TB = B
    elif B <= 2 * block_b:
        TB = _round_up(-(-B // 2), 16)          # cdiv(B, 2) rounded to 16
    else:
        TB = block_b
    nb = pl.cdiv(B, TB)

    # VMEM budget: double-buffered x/mean tiles + (double-buffered) W, bias,
    # plus ~2 MiB compiler headroom. Capped well below v7x's 64 MiB.
    xb = jnp.dtype(compute_dtype).itemsize
    ob = jnp.dtype(out_dtype).itemsize
    budget = 2 * TB * K * xb + 2 * TB * N * ob + 2 * K * N * xb + 2 * N * 4
    vmem_limit = int(min(48 * 2**20, max(16 * 2**20, budget + 2 * 2**20)))

    cost = pl.CostEstimate(
        flops=2 * B * K * N,
        transcendentals=0,
        bytes_accessed=B * K * xb + K * N * xb + N * 4 + B * N * ob,
    )

    mean = pl.pallas_call(
        diag_gaussian_mean_kernel,
        out_shape=jax.ShapeDtypeStruct((B, N), out_dtype),
        grid=(nb,),
        in_specs=[
            pl.BlockSpec((TB, K), lambda i: (i, 0)),   # x tile, pipelined over batch
            pl.BlockSpec((K, N), lambda i: (0, 0)),    # W: same block every step
            pl.BlockSpec((1, N), lambda i: (0, 0)),    # bias: same block every step
        ],
        out_specs=pl.BlockSpec((TB, N), lambda i: (i, 0)),
        compiler_params=pltpu.CompilerParams(
            dimension_semantics=("parallel",),         # splits grid across v7x's 2 TCs
            vmem_limit_bytes=vmem_limit,
        ),
        cost_estimate=cost,
    )(x_c, w_c, b_c)

    # std = exp(logstd): independent of x -> computed once, broadcast lazily
    # at the consumer instead of materializing B redundant copies.
    std = jnp.exp(logstd.astype(jnp.float32)).astype(out_dtype)

    return mean, std


def init_params(key, num_inputs, num_outputs, dtype=jnp.float32):
    """Deterministic init mirroring the PyTorch module:
       - fc_mean.weight ~ init_normc_: N(0,1) rows normalized over input dim
       - fc_mean.bias   = 0
       - logstd (AddBias param) = 0
    """
    w = jax.random.normal(key, (num_outputs, num_inputs), dtype=jnp.float32)
    w = w / jnp.sqrt(jnp.sum(w * w, axis=1, keepdims=True))
    weight_t = jnp.asarray(w.T, dtype)          # (num_inputs, num_outputs)
    bias = jnp.zeros((1, num_outputs), dtype)
    logstd = jnp.zeros((1, num_outputs), dtype)
    return weight_t, bias, logstd


if __name__ == "__main__":
    key = jax.random.PRNGKey(0)
    k_x, k_w = jax.random.split(key)

    B, num_inputs, num_outputs = 8, 32, 8
    x = jax.random.normal(k_x, (B, num_inputs), dtype=jnp.float32)
    weight_t, bias, logstd = init_params(k_w, num_inputs, num_outputs)

    mean, std = diag_gaussian_forward(x, weight_t, bias, logstd)
    jax.block_until_ready((mean, std))

    # Reference check (plain JAX). The kernel reads x/W in bf16 with f32
    # accumulation, so compare against the identically-cast reference.
    x_c = x.astype(jnp.bfloat16).astype(jnp.float32)
    w_c = weight_t.astype(jnp.bfloat16).astype(jnp.float32)
    mean_ref = x_c @ w_c + bias
    std_ref = jnp.exp(logstd)                              # (1, N), broadcastable

    assert mean.shape == (B, num_outputs)
    assert jnp.allclose(mean, mean_ref, atol=1e-4, rtol=1e-4)
    assert jnp.allclose(jnp.broadcast_to(std, (B, num_outputs)),
                        jnp.broadcast_to(std_ref, (B, num_outputs)),
                        atol=1e-6, rtol=1e-6)

    print("KERNEL_OK")
</pallas_src>

<mosaic_0001>
module attributes {stable_mosaic.version = 11 : i64} {
  func.func @diag_gaussian_mean_kernel(%arg0: i32, %arg1: memref<8x32xbf16, #tpu.memory_space<vmem>>, %arg2: memref<32x8xbf16, #tpu.memory_space<vmem>>, %arg3: memref<1x8xf32, #tpu.memory_space<vmem>>, %arg4: memref<8x8xf32, #tpu.memory_space<vmem>>) attributes {dimension_semantics = [#tpu.dimension_semantics<parallel>], iteration_bounds = array<i64: 1>, scalar_prefetch = 0 : i64, scratch_operands = 0 : i64, tpu.core_type = #tpu.core_type<tc>, window_params = [{transform_indices = @transform_0, window_bounds = array<i64: 8, 32>}, {pipeline_mode = #tpu.pipeline_mode<synchronous>, transform_indices = @transform_1, window_bounds = array<i64: 32, 8>}, {pipeline_mode = #tpu.pipeline_mode<synchronous>, transform_indices = @transform_2, window_bounds = array<i64: 1, 8>}, {transform_indices = @transform_3, window_bounds = array<i64: 8, 8>}]} {
    %c0 = arith.constant 0 : index
    %c0_0 = arith.constant 0 : index
    %0 = vector.load %arg1[%c0, %c0_0] : memref<8x32xbf16, #tpu.memory_space<vmem>>, vector<8x32xbf16>
    %c0_1 = arith.constant 0 : index
    %c0_2 = arith.constant 0 : index
    %1 = vector.load %arg2[%c0_1, %c0_2] : memref<32x8xbf16, #tpu.memory_space<vmem>>, vector<32x8xbf16>
    %cst = arith.constant dense<0.000000e+00> : vector<8x8xf32>
    %2 = tpu.matmul %0, %1, %cst {dimension_numbers = #tpu.dot_dimension_numbers<[1], [0], [0], [1], [0, 0, 1, 1], [], []>} : vector<8x32xbf16>, vector<32x8xbf16>, vector<8x8xf32> -> vector<8x8xf32>
    %c0_3 = arith.constant 0 : index
    %c0_4 = arith.constant 0 : index
    %3 = vector.load %arg3[%c0_3, %c0_4] : memref<1x8xf32, #tpu.memory_space<vmem>>, vector<1x8xf32>
    %4 = vector.broadcast %3 : vector<1x8xf32> to vector<8x8xf32>
    %5 = arith.addf %2, %4 : vector<8x8xf32>
    %c0_5 = arith.constant 0 : index
    %c0_6 = arith.constant 0 : index
    %6 = vector.load %arg4[%c0_5, %c0_6] : memref<8x8xf32, #tpu.memory_space<vmem>>, vector<8x8xf32>
    tpu.vector_store %arg4[%c0_5, %c0_6], %5 {strides = array<i32>} : memref<8x8xf32, #tpu.memory_space<vmem>>, vector<8x8xf32>,
    return
  }
  func.func @transform_0(%arg0: i32) -> (i32, i32) {
    %c0_i32 = arith.constant 0 : i32
    %c0_i32_0 = arith.constant 0 : i32
    return %arg0, %c0_i32 : i32, i32
  }
  func.func @transform_1(%arg0: i32) -> (i32, i32) {
    %c0_i32 = arith.constant 0 : i32
    %c0_i32_0 = arith.constant 0 : i32
    %c0_i32_1 = arith.constant 0 : i32
    return %c0_i32, %c0_i32_0 : i32, i32
  }
  func.func @transform_2(%arg0: i32) -> (i32, i32) {
    %c0_i32 = arith.constant 0 : i32
    %c0_i32_0 = arith.constant 0 : i32
    %c0_i32_1 = arith.constant 0 : i32
    return %c0_i32, %c0_i32_0 : i32, i32
  }
  func.func @transform_3(%arg0: i32) -> (i32, i32) {
    %c0_i32 = arith.constant 0 : i32
    %c0_i32_0 = arith.constant 0 : i32
    return %arg0, %c0_i32 : i32, i32
  }
}

</mosaic_0001>

<bundles_post_ra>
// kernel: tpu_custom_call.1
= control target key start
LH: loop header
LB: loop body
LE: loop exit
PB: predicated region body
PF: predicated region fallthrough
CT: control target
= control target key end

     0   :  { %s147_s0 = inlined_call_operand.vmem [shape: bf16[8,32], index: 0, kind: input, shape index: {}]   ;;  %s148_s1 = inlined_call_operand.vmem [shape: bf16[32,8], index: 1, kind: input, shape index: {}]   ;;  %s149_s2 = inlined_call_operand.vmem [shape: f32[1,8], index: 2, kind: input, shape index: {}]   ;;  %s150_s3 = inlined_call_operand.hbm [shape: f32[8,8], index: 3, kind: output, shape index: {}]  }
   0x1   :  { %v82_v0 = vld [vmem:[%s148_s1 + $0x8] sm:$0xff] }
   0x2   :  { %8 = vsyncpa [#allocation3], 0  ;;  %47 = vmatpush.bf16.msra.mxu0 %v82_v0  ;;  %v81_v1 = vld [vmem:[%s148_s1] sm:$0xff]  ;;  %vm37_vm0 = vcmask 261120   ;;  %s111_s20 = smov [#allocation2]   ;;  %s63_s24 = sshll.u32 %s150_s3, 4  ;;  %s64_s24 = int_to_ptr.hbm [resolvable:$true] %s63_s24 }
   0x3   :  { %v16_v2 = vld [vmem:[%s147_s0] sm:$0xf]  ;;  %s61_s21 = sshll.u32 %s111_s20, 4  ;;  %vm54_vm1 = vcmask 64512   ;;  %s62_s21 = int_to_ptr.vmem [resolvable:$true] %s61_s21 }
   0x4   :  { %v84_v3 = vld [vmem:[%s149_s2] ss:$0 sm:$0xff] }
   0x6   :  { %48 = vmatpush.bf16.msra.mxu0 %v81_v1 }
   0x9   :  { %80 = vmatmul.msk.bf16.vlgmr.msra.gmra.mxu0 %vm37_vm0, %v16_v2 }
  0x86   :  { %v50_v4 = vpop.f32.mrf.mxu0 }
  0x87   :  { %v51_v5 = vadd.f32 %v84_v3, %v50_v4 }
  0x89   :  { %55 = vst.msk [vmem:[#allocation2] sm:$0xff] %vm54_vm1, %v51_v5 }
  0x8a   :  { %66 = dma.vmem_to_hbm [thread:$0]  %s62_s21, 128, %s64_s24, [#allocation3]  }
  0x8e   :  { %v52_v6 = vpop.f32.mrf.mxu0 }
  0x8f   :  { %109 = dma.done.wait [#allocation3], 128  }
  0x90   :  { %110 = vsyncadd [#allocation3], 4294967168 }
  0x91   :  { %71 = vsyncpa [#allocation3], 1 }

</bundles_post_ra>
